<compile_context>
chip_gen: v5e
topology: v5e:2x2
jax: 0.10.0
libtpu: 0.0.40
codegen_flags: <defaults>
</compile_context>

<pallas_src>
import functools

import jax
import jax.numpy as jnp
from jax.experimental import pallas as pl
from jax.experimental.pallas import tpu as pltpu

_ALIGN = 16  # batch-tile alignment (bf16 output sublane packing; also covers f32's 8)


def dqn_kernel(x_ref, w1_ref, b1_ref, w2_ref, b2_ref, w3_ref, b3_ref, o_ref):
    # x arrives as f32; cast to bf16 in-kernel (VPU op, hidden under the x DMA).
    x = x_ref[...].astype(w1_ref.dtype)
    # Layer 1: Linear + ReLU (bf16 MXU matmul, f32 accumulation; bias/ReLU in f32).
    h1 = jnp.dot(x, w1_ref[...], preferred_element_type=jnp.float32)
    h1 = jnp.maximum(h1 + b1_ref[...], 0.0)
    # Layer 2: Linear + ReLU. Padded hidden columns stay exactly zero.
    h2 = jnp.dot(h1.astype(w2_ref.dtype), w2_ref[...],
                 preferred_element_type=jnp.float32)
    h2 = jnp.maximum(h2 + b2_ref[...], 0.0)
    # Layer 3: Linear (Q-values, no activation). Padded output columns are zero.
    q = jnp.dot(h2.astype(w3_ref.dtype), w3_ref[...],
                preferred_element_type=jnp.float32) + b3_ref[...]
    o_ref[...] = q.astype(o_ref.dtype)  # bf16 store: halves output HBM traffic


def _round_up(x, m):
    return ((x + m - 1) // m) * m


def prepare_params(params, *, compute_dtype=jnp.bfloat16):
    """One-time weight preparation (do NOT call per forward pass).

    - hidden dim padded 64 -> 128 (numerically exact through ReLU: zero bias,
      zero extra rows/columns)
    - output dim padded to a multiple of 128 (lane-dense output stores)
    - weights cast to bf16 (MXU-native rate), biases kept f32
    Weights are stored [in_features, out_features] (transpose of PyTorch [out, in]).
    """
    w1, b1, w2, b2, w3, b3 = (params[k] for k in ("w1", "b1", "w2", "b2", "w3", "b3"))
    in_dim, hid = w1.shape
    out_dim = w3.shape[1]
    hp = _round_up(hid, 128)
    op = _round_up(out_dim, 128)

    w1p = jnp.zeros((in_dim, hp), jnp.float32).at[:, :hid].set(w1)
    b1p = jnp.zeros((1, hp), jnp.float32).at[:, :hid].set(b1)
    w2p = jnp.zeros((hp, hp), jnp.float32).at[:hid, :hid].set(w2)
    b2p = jnp.zeros((1, hp), jnp.float32).at[:, :hid].set(b2)
    w3p = jnp.zeros((hp, op), jnp.float32).at[:hid, :out_dim].set(w3)
    b3p = jnp.zeros((1, op), jnp.float32).at[:, :out_dim].set(b3)

    arrays = {
        "w1": w1p.astype(compute_dtype), "b1": b1p,
        "w2": w2p.astype(compute_dtype), "b2": b2p,
        "w3": w3p.astype(compute_dtype), "b3": b3p,
    }
    return {"arrays": arrays, "out_dim": out_dim}


@functools.partial(jax.jit, static_argnames=("out_dim", "tm_target"))
def _dqn_forward_impl(x, arrays, *, out_dim, tm_target):
    w1, b1, w2, b2, w3, b3 = (arrays[k] for k in ("w1", "b1", "w2", "b2", "w3", "b3"))
    B, in_dim = x.shape
    op = w3.shape[1]

    # --- batch tile selection (static Python math on shapes) ---
    pb_min = _round_up(B, _ALIGN)
    # Aim for >= 2 grid steps so v7x's two TensorCores both get work; no-op elsewhere.
    tm = min(tm_target, _round_up(pl.cdiv(pb_min, 2), _ALIGN))
    tm = max(tm, _ALIGN)
    pb = _round_up(B, tm)

    # Pad the batch so the last tile never writes garbage rows (fuses under jit).
    xp = x if pb == B else jnp.zeros((pb, in_dim), x.dtype).at[:B].set(x)

    resident = lambda shape: pl.BlockSpec(shape, lambda i: (0, 0))  # VMEM-resident

    out = pl.pallas_call(
        dqn_kernel,
        out_shape=jax.ShapeDtypeStruct((pb, op), jnp.bfloat16),
        grid=(pl.cdiv(pb, tm),),
        in_specs=[
            pl.BlockSpec((tm, in_dim), lambda i: (i, 0)),  # x tiles, double-buffered
            resident(w1.shape), resident(b1.shape),
            resident(w2.shape), resident(b2.shape),
            resident(w3.shape), resident(b3.shape),
        ],
        out_specs=pl.BlockSpec((tm, op), lambda i: (i, 0)),
        compiler_params=pltpu.CompilerParams(
            dimension_semantics=("parallel",),  # shard batch tiles across TCs on v7x
        ),
    )(xp, w1, b1, w2, b2, w3, b3)

    # Tiny slice + up-cast; fuses under jit.
    return out[:B, :out_dim].astype(jnp.float32)


def dqn_forward(x, prepared, *, tm_target=1024):
    """x: [B, input_dim] f32. prepared: prepare_params(...). Returns [B, out_dim] f32."""
    return _dqn_forward_impl(x, prepared["arrays"],
                             out_dim=prepared["out_dim"], tm_target=tm_target)


def init_params(key, input_dim, output_dim, hidden=64):
    """Deterministic init mimicking PyTorch Linear default (U[-1/sqrt(fan_in), ...])."""
    def linear(key, fan_in, fan_out):
        kw, kb = jax.random.split(key)
        bound = 1.0 / jnp.sqrt(jnp.float32(fan_in))
        w = jax.random.uniform(kw, (fan_in, fan_out), jnp.float32, -bound, bound)
        b = jax.random.uniform(kb, (1, fan_out), jnp.float32, -bound, bound)
        return w, b

    k1, k2, k3 = jax.random.split(key, 3)
    w1, b1 = linear(k1, input_dim, hidden)
    w2, b2 = linear(k2, hidden, hidden)
    w3, b3 = linear(k3, hidden, output_dim)
    return {"w1": w1, "b1": b1, "w2": w2, "b2": b2, "w3": w3, "b3": b3}


def dqn_ref(x, p):
    """Pure-JAX f32 reference (PyTorch-equivalent forward)."""
    h1 = jnp.maximum(x @ p["w1"] + p["b1"], 0.0)
    h2 = jnp.maximum(h1 @ p["w2"] + p["b2"], 0.0)
    return h2 @ p["w3"] + p["b3"]


if __name__ == "__main__":
    key = jax.random.PRNGKey(0)
    kx, kp, kx2 = jax.random.split(key, 3)

    input_dim = 16    # e.g. flattened state vector
    output_dim = 4    # e.g. Breakout action space
    params = init_params(kp, input_dim, output_dim)
    prepared = prepare_params(params)   # one-time pad/cast (not per forward call)

    # Small inference-style batch (single grid step, padded lane-dense output).
    batch = 8
    x = jax.random.normal(kx, (batch, input_dim), dtype=jnp.float32)
    out = jax.block_until_ready(dqn_forward(x, prepared))
    ref = dqn_ref(x, params)
    assert out.shape == (batch, output_dim)
    # bf16 compute/output with f32 accumulation: intentional precision choice.
    assert jnp.allclose(out, ref, atol=5e-2, rtol=5e-2), "mismatch vs reference (B=8)"

    # Batch that is not a multiple of the tile: exercises the 2-step grid,
    # VMEM-resident weights, and the zero-padded final tile.
    batch2 = 200
    x2 = jax.random.normal(kx2, (batch2, input_dim), dtype=jnp.float32)
    out2 = jax.block_until_ready(dqn_forward(x2, prepared))
    ref2 = dqn_ref(x2, params)
    assert out2.shape == (batch2, output_dim)
    assert jnp.allclose(out2, ref2, atol=5e-2, rtol=5e-2), "mismatch vs reference (B=200)"

    print("KERNEL_OK")
</pallas_src>

<mosaic_0001>
module attributes {stable_mosaic.version = 11 : i64} {
  func.func @dqn_kernel(%arg0: i32, %arg1: memref<16x16xf32, #tpu.memory_space<vmem>>, %arg2: memref<16x128xbf16, #tpu.memory_space<vmem>>, %arg3: memref<1x128xf32, #tpu.memory_space<vmem>>, %arg4: memref<128x128xbf16, #tpu.memory_space<vmem>>, %arg5: memref<1x128xf32, #tpu.memory_space<vmem>>, %arg6: memref<128x128xbf16, #tpu.memory_space<vmem>>, %arg7: memref<1x128xf32, #tpu.memory_space<vmem>>, %arg8: memref<16x128xbf16, #tpu.memory_space<vmem>>) attributes {dimension_semantics = [#tpu.dimension_semantics<parallel>], iteration_bounds = array<i64: 1>, scalar_prefetch = 0 : i64, scratch_operands = 0 : i64, tpu.core_type = #tpu.core_type<tc>, window_params = [{transform_indices = @transform_0, window_bounds = array<i64: 16, 16>}, {pipeline_mode = #tpu.pipeline_mode<synchronous>, transform_indices = @transform_1, window_bounds = array<i64: 16, 128>}, {pipeline_mode = #tpu.pipeline_mode<synchronous>, transform_indices = @transform_2, window_bounds = array<i64: 1, 128>}, {pipeline_mode = #tpu.pipeline_mode<synchronous>, transform_indices = @transform_3, window_bounds = array<i64: 128, 128>}, {pipeline_mode = #tpu.pipeline_mode<synchronous>, transform_indices = @transform_4, window_bounds = array<i64: 1, 128>}, {pipeline_mode = #tpu.pipeline_mode<synchronous>, transform_indices = @transform_5, window_bounds = array<i64: 128, 128>}, {pipeline_mode = #tpu.pipeline_mode<synchronous>, transform_indices = @transform_6, window_bounds = array<i64: 1, 128>}, {transform_indices = @transform_7, window_bounds = array<i64: 16, 128>}]} {
    %c0 = arith.constant 0 : index
    %c0_0 = arith.constant 0 : index
    %0 = vector.load %arg1[%c0, %c0_0] : memref<16x16xf32, #tpu.memory_space<vmem>>, vector<16x16xf32>
    %1 = arith.truncf %0 : vector<16x16xf32> to vector<16x16xbf16>
    %c0_1 = arith.constant 0 : index
    %c0_2 = arith.constant 0 : index
    %2 = vector.load %arg2[%c0_1, %c0_2] : memref<16x128xbf16, #tpu.memory_space<vmem>>, vector<16x128xbf16>
    %cst = arith.constant dense<0.000000e+00> : vector<16x128xf32>
    %3 = tpu.matmul %1, %2, %cst {dimension_numbers = #tpu.dot_dimension_numbers<[1], [0], [0], [1], [0, 0, 1, 1], [], []>} : vector<16x16xbf16>, vector<16x128xbf16>, vector<16x128xf32> -> vector<16x128xf32>
    %c0_3 = arith.constant 0 : index
    %c0_4 = arith.constant 0 : index
    %4 = vector.load %arg3[%c0_3, %c0_4] : memref<1x128xf32, #tpu.memory_space<vmem>>, vector<1x128xf32>
    %5 = vector.broadcast %4 : vector<1x128xf32> to vector<16x128xf32>
    %6 = arith.addf %3, %5 : vector<16x128xf32>
    %cst_5 = arith.constant 0.000000e+00 : f32
    %7 = vector.broadcast %cst_5 : f32 to vector<16x128xf32>
    %8 = arith.maximumf %6, %7 : vector<16x128xf32>
    %9 = arith.truncf %8 : vector<16x128xf32> to vector<16x128xbf16>
    %c0_6 = arith.constant 0 : index
    %c0_7 = arith.constant 0 : index
    %10 = vector.load %arg4[%c0_6, %c0_7] : memref<128x128xbf16, #tpu.memory_space<vmem>>, vector<128x128xbf16>
    %cst_8 = arith.constant dense<0.000000e+00> : vector<16x128xf32>
    %11 = tpu.matmul %9, %10, %cst_8 {dimension_numbers = #tpu.dot_dimension_numbers<[1], [0], [0], [1], [0, 0, 1, 1], [], []>} : vector<16x128xbf16>, vector<128x128xbf16>, vector<16x128xf32> -> vector<16x128xf32>
    %c0_9 = arith.constant 0 : index
    %c0_10 = arith.constant 0 : index
    %12 = vector.load %arg5[%c0_9, %c0_10] : memref<1x128xf32, #tpu.memory_space<vmem>>, vector<1x128xf32>
    %13 = vector.broadcast %12 : vector<1x128xf32> to vector<16x128xf32>
    %14 = arith.addf %11, %13 : vector<16x128xf32>
    %cst_11 = arith.constant 0.000000e+00 : f32
    %15 = vector.broadcast %cst_11 : f32 to vector<16x128xf32>
    %16 = arith.maximumf %14, %15 : vector<16x128xf32>
    %17 = arith.truncf %16 : vector<16x128xf32> to vector<16x128xbf16>
    %c0_12 = arith.constant 0 : index
    %c0_13 = arith.constant 0 : index
    %18 = vector.load %arg6[%c0_12, %c0_13] : memref<128x128xbf16, #tpu.memory_space<vmem>>, vector<128x128xbf16>
    %cst_14 = arith.constant dense<0.000000e+00> : vector<16x128xf32>
    %19 = tpu.matmul %17, %18, %cst_14 {dimension_numbers = #tpu.dot_dimension_numbers<[1], [0], [0], [1], [0, 0, 1, 1], [], []>} : vector<16x128xbf16>, vector<128x128xbf16>, vector<16x128xf32> -> vector<16x128xf32>
    %c0_15 = arith.constant 0 : index
    %c0_16 = arith.constant 0 : index
    %20 = vector.load %arg7[%c0_15, %c0_16] : memref<1x128xf32, #tpu.memory_space<vmem>>, vector<1x128xf32>
    %21 = vector.broadcast %20 : vector<1x128xf32> to vector<16x128xf32>
    %22 = arith.addf %19, %21 : vector<16x128xf32>
    %23 = arith.truncf %22 : vector<16x128xf32> to vector<16x128xbf16>
    %c0_17 = arith.constant 0 : index
    %c0_18 = arith.constant 0 : index
    %24 = vector.load %arg8[%c0_17, %c0_18] : memref<16x128xbf16, #tpu.memory_space<vmem>>, vector<16x128xbf16>
    tpu.vector_store %arg8[%c0_17, %c0_18], %23 {strides = array<i32>} : memref<16x128xbf16, #tpu.memory_space<vmem>>, vector<16x128xbf16>,
    return
  }
  func.func @transform_0(%arg0: i32) -> (i32, i32) {
    %c0_i32 = arith.constant 0 : i32
    %c0_i32_0 = arith.constant 0 : i32
    return %arg0, %c0_i32 : i32, i32
  }
  func.func @transform_1(%arg0: i32) -> (i32, i32) {
    %c0_i32 = arith.constant 0 : i32
    %c0_i32_0 = arith.constant 0 : i32
    %c0_i32_1 = arith.constant 0 : i32
    return %c0_i32, %c0_i32_0 : i32, i32
  }
  func.func @transform_2(%arg0: i32) -> (i32, i32) {
    %c0_i32 = arith.constant 0 : i32
    %c0_i32_0 = arith.constant 0 : i32
    %c0_i32_1 = arith.constant 0 : i32
    return %c0_i32, %c0_i32_0 : i32, i32
  }
  func.func @transform_3(%arg0: i32) -> (i32, i32) {
    %c0_i32 = arith.constant 0 : i32
    %c0_i32_0 = arith.constant 0 : i32
    %c0_i32_1 = arith.constant 0 : i32
    return %c0_i32, %c0_i32_0 : i32, i32
  }
  func.func @transform_4(%arg0: i32) -> (i32, i32) {
    %c0_i32 = arith.constant 0 : i32
    %c0_i32_0 = arith.constant 0 : i32
    %c0_i32_1 = arith.constant 0 : i32
    return %c0_i32, %c0_i32_0 : i32, i32
  }
  func.func @transform_5(%arg0: i32) -> (i32, i32) {
    %c0_i32 = arith.constant 0 : i32
    %c0_i32_0 = arith.constant 0 : i32
    %c0_i32_1 = arith.constant 0 : i32
    return %c0_i32, %c0_i32_0 : i32, i32
  }
  func.func @transform_6(%arg0: i32) -> (i32, i32) {
    %c0_i32 = arith.constant 0 : i32
    %c0_i32_0 = arith.constant 0 : i32
    %c0_i32_1 = arith.constant 0 : i32
    return %c0_i32, %c0_i32_0 : i32, i32
  }
  func.func @transform_7(%arg0: i32) -> (i32, i32) {
    %c0_i32 = arith.constant 0 : i32
    %c0_i32_0 = arith.constant 0 : i32
    return %arg0, %c0_i32 : i32, i32
  }
}

</mosaic_0001>

<bundles_post_ra>
// kernel: _dqn_forward_impl.1
= control target key start
LH: loop header
LB: loop body
LE: loop exit
PB: predicated region body
PF: predicated region fallthrough
CT: control target
= control target key end

     0   :  { %12 = vsyncpa [#allocation3], 0  ;;  %s493_s0 = inlined_call_operand.vmem [shape: f32[16,16], index: 0, kind: input, shape index: {}]   ;;  %s494_s1 = inlined_call_operand.vmem [shape: bf16[16,128], index: 1, kind: input, shape index: {}]   ;;  %s495_s2 = inlined_call_operand.vmem [shape: f32[1,128], index: 2, kind: input, shape index: {}]   ;;  %s496_s3 = inlined_call_operand.hbm [shape: bf16[128,128], index: 3, kind: input, shape index: {}]   ;;  %s497_s4 = inlined_call_operand.vmem [shape: f32[1,128], index: 4, kind: input, shape index: {}]   ;;  %s498_s5 = inlined_call_operand.hbm [shape: bf16[128,128], index: 5, kind: input, shape index: {}]   ;;  %s499_s6 = inlined_call_operand.vmem [shape: f32[1,128], index: 6, kind: input, shape index: {}]   ;;  %s500_s7 = inlined_call_operand.vmem [shape: bf16[16,128], index: 7, kind: output, shape index: {}]  }
   0x1   :  { %s24_s26 = sshll.u32 %s496_s3, 4  ;;  %s25_s26 = int_to_ptr.hbm [resolvable:$true] %s24_s26 }
   0x2   :  { %13 = vsyncpa [#allocation5], 0  ;;  %s422_s27 = smov [#allocation2]   ;;  %s39_s8 = sshll.u32 %s498_s5, 4  ;;  %s40_s8 = int_to_ptr.hbm [resolvable:$true] %s39_s8 }
   0x3   :  { %s26_s28 = sshll.u32 %s422_s27, 4  ;;  %s423_s9 = smov 64   ;;  %s27_s28 = int_to_ptr.vmem [resolvable:$true] %s26_s28 }
   0x4   :  { %s424_s10 = smov 4   ;;  %s425_s11 = smov [#allocation4]  }
   0x5   :  { %32 = dma.hbm_to_vmem [thread:$0]  %s25_s26, 1024, %s27_s28, [#allocation3], %s423_s9, %s423_s9, %s424_s10  }
   0x6   :  { %s41_s12 = sshll.u32 %s425_s11, 4  ;;  %s42_s12 = int_to_ptr.vmem [resolvable:$true] %s41_s12 }
   0x7   :  { %47 = dma.hbm_to_vmem [thread:$0]  %s40_s8, 1024, %s42_s12, [#allocation5], %s423_s9, %s423_s9, %s424_s10  }
   0x8   :  { %418 = dma.done.wait [#allocation3], 1024  }
   0x9   :  { %419 = vsyncadd [#allocation3], 4294966272 }
   0xa   :  { %420 = dma.done.wait [#allocation5], 1024  }
   0xb   :  { %421 = vsyncadd [#allocation5], 4294966272  ;;  %v341_v0 = vld [vmem:[%s494_s1] sm:$0xff]  ;;  %v60_v2 = vld [vmem:[%s493_s0 + $0x8] sm:$0xff]  ;;  %vm74_vm0 = vcmask 130048  }
   0xc   :  { %v59_v1 = vld [vmem:[%s493_s0] sm:$0xff]  ;;  %v349_v4 = vld [vmem:[#allocation2 + $0x38] sm:$0xff]  ;;  %85 = vmatpush.bf16.msra.mxu0 %v341_v0  ;;  %v348_v5 = vld [vmem:[#allocation2 + $0x30] sm:$0xff] }
   0xd   :  { %v61_v3 = vpack.c.bf16 %v60_v2, %v59_v1  ;;  %163 = vmatpush.bf16.msra.mxu1 %v349_v4  ;;  %v347_v6 = vld [vmem:[#allocation2 + $0x28] sm:$0xff]  ;;  %v346_v7 = vld [vmem:[#allocation2 + $0x20] sm:$0xff]  ;;  %v345_v8 = vld [vmem:[#allocation2 + $0x18] sm:$0xff] }
   0xe   :  { %v344_v9 = vld [vmem:[#allocation2 + $0x10] sm:$0xff]  ;;  %v343_v10 = vld [vmem:[#allocation2 + $0x8] sm:$0xff]  ;;  %v342_v11 = vld [vmem:[#allocation2] sm:$0xff] }
   0xf   :  { %276 = vmatmul.msk.bf16.vlgmr.msra.gmra.mxu0 %vm74_vm0, %v61_v3  ;;  %v357_v12 = vld [vmem:[#allocation4 + $0x38] sm:$0xff]  ;;  %v356_v13 = vld [vmem:[#allocation4 + $0x30] sm:$0xff]  ;;  %v355_v14 = vld [vmem:[#allocation4 + $0x28] sm:$0xff] }
  0x10   :  { %248 = vmatpush.bf16.msra.mxu2 %v357_v12  ;;  %v354_v15 = vld [vmem:[#allocation4 + $0x20] sm:$0xff]  ;;  %v353_v24 = vld [vmem:[#allocation4 + $0x18] sm:$0xff]  ;;  %v352_v25 = vld [vmem:[#allocation4 + $0x10] sm:$0xff] }
  0x11   :  { %164 = vmatpush.bf16.msra.mxu1 %v348_v5  ;;  %v367_v17 = vld [vmem:[%s495_s2] ss:$0 sm:$0xff]  ;;  %v351_v26 = vld [vmem:[#allocation4 + $0x8] sm:$0xff] }
  0x12   :  { %v350_v27 = vld [vmem:[#allocation4] sm:$0xff] }
  0x13   :  { %v368_v29 = vld [vmem:[%s497_s4] ss:$0 sm:$0xff] }
  0x14   :  { %249 = vmatpush.bf16.msra.mxu2 %v356_v13  ;;  %v369_v37 = vld [vmem:[%s499_s6] ss:$0 sm:$0xff] }
  0x15   :  { %165 = vmatpush.bf16.msra.mxu1 %v347_v6 }
  0x18   :  { %250 = vmatpush.bf16.msra.mxu2 %v355_v14 }
  0x19   :  { %166 = vmatpush.bf16.msra.mxu1 %v346_v7 }
  0x1c   :  { %251 = vmatpush.bf16.msra.mxu2 %v354_v15 }
  0x1d   :  { %167 = vmatpush.bf16.msra.mxu1 %v345_v8 }
  0x20   :  { %252 = vmatpush.bf16.msra.mxu2 %v353_v24 }
  0x21   :  { %168 = vmatpush.bf16.msra.mxu1 %v344_v9 }
  0x24   :  { %253 = vmatpush.bf16.msra.mxu2 %v352_v25 }
  0x25   :  { %169 = vmatpush.bf16.msra.mxu1 %v343_v10 }
  0x28   :  { %254 = vmatpush.bf16.msra.mxu2 %v351_v26 }
  0x29   :  { %170 = vmatpush.bf16.msra.mxu1 %v342_v11 }
  0x2c   :  { %255 = vmatpush.bf16.msra.mxu2 %v350_v27 }
  0x8c   :  { %v87_v16 = vpop.f32.mrf.mxu0 }
  0x8d   :  { %v88_v18 = vadd.f32 %v367_v17, %v87_v16 }
  0x8f   :  { %v92_v21 = vmax.f32 %v88_v18, 0.0 }
  0x94   :  { %v89_v19 = vpop.f32.mrf.mxu0 }
  0x95   :  { %v90_v20 = vadd.f32 %v367_v17, %v89_v19 }
  0x97   :  { %v93_v22 = vmax.f32 %v90_v20, 0.0 }
  0x99   :  { %v94_v23 = vpack.c.bf16 %v93_v22, %v92_v21 }
  0x9b   :  { %171 = vmatmul.bf16.vlgmr.msra.gmra.mxu1 %v94_v23 }
 0x118   :  { %v172_v28 = vpop.f32.mrf.mxu1 }
 0x119   :  { %v173_v30 = vadd.f32 %v368_v29, %v172_v28 }
 0x11b   :  { %v177_v33 = vmax.f32 %v173_v30, 0.0 }
 0x120   :  { %v174_v31 = vpop.f32.mrf.mxu1 }
 0x121   :  { %v175_v32 = vadd.f32 %v368_v29, %v174_v31 }
 0x123   :  { %v178_v34 = vmax.f32 %v175_v32, 0.0 }
 0x125   :  { %v179_v35 = vpack.c.bf16 %v178_v34, %v177_v33 }
 0x127   :  { %256 = vmatmul.bf16.vlgmr.msra.gmra.mxu2 %v179_v35 }
 0x1aa   :  { %v257_v36 = vpop.f32.mrf.mxu2 }
 0x1ab   :  { %v258_v39 = vadd.f32 %v369_v37, %v257_v36 }
 0x1b2   :  { %v259_v38 = vpop.f32.mrf.mxu2 }
 0x1b3   :  { %v260_v40 = vadd.f32 %v369_v37, %v259_v38 }
 0x1b5   :  { %v361_v41 = vpack.c.bf16 %v260_v40, %v258_v39 }
 0x1b7   :  { %362 = vst [vmem:[%s500_s7] sm:$0xff] %v361_v41  }
 0x1b8   :  { %270 = vsyncpa [#allocation3], 1 }
 0x1b9   :  { %271 = vsyncpa [#allocation5], 1 }

</bundles_post_ra>
